<compile_context>
chip_gen: v7x
topology: tpu7x:2x2x1
jax: 0.10.0
libtpu: 0.0.40
codegen_flags: <defaults>
</compile_context>

<pallas_src>
import functools
import math

import jax
import jax.numpy as jnp
from jax.experimental import pallas as pl
from jax.experimental.pallas import tpu as pltpu

EPS = 1e-7
GAMMA = 2              # CEandCenter.forward calls self.ce(x, y, gamma=2)
CENTER_WEIGHT = 1.0    # CEandCenter default center_weight
LOG_EPS = math.log(EPS)
LOG_1M_EPS = math.log1p(-EPS)


def _ce_and_center_kernel(x_ref, y_ref, feat_ref, centers_ref, out_ref, acc_ref,
                          *, inv_batch):
    i = pl.program_id(0)

    @pl.when(i == 0)
    def _init():
        acc_ref[0] = jnp.float32(0.0)

    x = x_ref[...].astype(jnp.float32)               # (TB, C)
    y = y_ref[...].astype(jnp.float32)               # (TB, C)
    feat = feat_ref[...].astype(jnp.float32)         # (TB, D)
    center = centers_ref[...].astype(jnp.float32)    # (1, D)

    # ---- focal cross-entropy (gamma == GAMMA) ----
    m = jnp.max(x, axis=1, keepdims=True)
    s = x - m
    e = jnp.exp(s)                                   # single full-tile exp (EUP)
    sum_e = jnp.sum(e, axis=1, keepdims=True)        # (TB, 1)
    lse = jnp.log(sum_e)                             # per-row log
    # log(clip(softmax, eps, 1-eps)) == clip(log_softmax, log eps, log(1-eps))
    logp = jnp.clip(s - lse, LOG_EPS, LOG_1M_EPS)
    # reuse e for the clipped softmax: per-row reciprocal + one VALU multiply
    p = jnp.clip(e * (1.0 / sum_e), EPS, 1.0 - EPS)
    one_minus_p = 1.0 - p
    # GAMMA is a Python int -> lax.integer_pow; for 2 this is a single multiply
    ce_row = jnp.sum(-y * logp * one_minus_p ** GAMMA,
                     axis=1, keepdims=True)          # (TB, 1)

    # ---- one-center loss ----
    # row selected iff argmax(y) != 0  <=>  column 0 is not the first-occurring
    # row maximum  <=>  y[:, 0] < rowmax(y)
    row_max = jnp.max(y, axis=1, keepdims=True)
    selected = (y[:, 0:1] < row_max).astype(jnp.float32)   # (TB, 1)
    d = feat - center                                      # (TB, D) broadcast
    sq = jnp.sum(d * d, axis=1, keepdims=True)             # (TB, 1)

    # ---- per-block partial sum, accumulated in the SMEM scratch ----
    combined = ce_row + (CENTER_WEIGHT * 0.5) * selected * sq
    acc_ref[0] += jnp.sum(combined)

    @pl.when(i == pl.num_programs(0) - 1)
    def _finalize():
        out_ref[0] = acc_ref[0] * inv_batch


def _round_up(n, m):
    return -(-n // m) * m


def _vmem_capacity_bytes():
    try:
        return int(pltpu.get_tpu_info().vmem_capacity_bytes)
    except Exception:
        return 64 * 1024 * 1024   # v7x per-TensorCore VMEM: safe lower bound


def _pick_block_rows(batch, c, d):
    """Largest multiple-of-8 row tile whose double-buffered blocks fit VMEM."""
    budget = min(_vmem_capacity_bytes() // 2, 48 * 1024 * 1024)
    bytes_per_row = (2 * c + d) * 4               # x + y + feat rows, f32
    tb = budget // (2 * bytes_per_row)            # 2 = input double-buffering
    tb = max(8, min(2048, (tb // 8) * 8))
    return min(tb, _round_up(batch, 8))


@jax.jit
def ce_and_center_loss(x, y, feat, centers):
    batch, c = x.shape
    d = feat.shape[1]

    tb = _pick_block_rows(batch, c, d)
    b_pad = _round_up(batch, tb)
    if b_pad != batch:
        # all-zero rows contribute exactly 0 to both loss terms
        pad = ((0, b_pad - batch), (0, 0))
        x = jnp.pad(x, pad)
        y = jnp.pad(y, pad)
        feat = jnp.pad(feat, pad)

    num_blocks = b_pad // tb
    block_bytes = (2 * tb * c + tb * d) * 4       # one step's x + y + feat tiles
    vmem_limit = int(min(_vmem_capacity_bytes(),
                         max(16 * 1024 * 1024,
                             2 * block_bytes + d * 4 + 8 * 1024 * 1024)))

    out = pl.pallas_call(
        functools.partial(_ce_and_center_kernel, inv_batch=1.0 / batch),
        out_shape=jax.ShapeDtypeStruct((1,), jnp.float32),
        grid_spec=pltpu.PrefetchScalarGridSpec(
            num_scalar_prefetch=0,
            grid=(num_blocks,),
            in_specs=[
                pl.BlockSpec((tb, c), lambda i: (i, 0)),    # x   (streamed)
                pl.BlockSpec((tb, c), lambda i: (i, 0)),    # y   (streamed)
                pl.BlockSpec((tb, d), lambda i: (i, 0)),    # feat (streamed)
                pl.BlockSpec((1, d), lambda i: (0, 0)),     # centers (resident)
            ],
            out_specs=pl.BlockSpec(memory_space=pltpu.MemorySpace.SMEM),
            scratch_shapes=[pltpu.SMEM((1,), jnp.float32)],
        ),
        compiler_params=pltpu.CompilerParams(
            dimension_semantics=("arbitrary",),   # carried SMEM accumulator
            vmem_limit_bytes=vmem_limit,
        ),
    )(x, y, feat, centers)
    return out[0]


def _reference(x, y, feat, centers, center_weight=CENTER_WEIGHT):
    # pure-JAX mirror of the PyTorch forward (CrossEntropyLoss(gamma=2) +
    # OneCenterLoss with mask_label == zeros, size_average=True)
    p = jax.nn.softmax(x, axis=1)
    p = jnp.clip(p, EPS, 1.0 - EPS)
    loss = -y * jnp.log(p) * (1.0 - p) ** GAMMA
    ce = jnp.mean(jnp.sum(loss, axis=-1))

    label = jnp.argmax(y, axis=1)
    b = feat.shape[0]
    mask = label != 0
    diff = feat - centers[0]
    per_row = jnp.sum(diff * diff, axis=1)
    center_loss = jnp.sum(jnp.where(mask, per_row, 0.0)) / 2.0 / b
    return ce + center_weight * center_loss


if __name__ == "__main__":
    B, C, D = 8, 4, 32
    key = jax.random.PRNGKey(0)
    kx, kl, kf, kc = jax.random.split(key, 4)

    x = jax.random.normal(kx, (B, C), dtype=jnp.float32)
    labels = jax.random.randint(kl, (B,), 0, C)
    y = jax.nn.one_hot(labels, C, dtype=jnp.float32)
    feat = jax.random.normal(kf, (B, D), dtype=jnp.float32)
    centers = jax.random.normal(kc, (1, D), dtype=jnp.float32)  # nn.Parameter

    loss = jax.block_until_ready(ce_and_center_loss(x, y, feat, centers))
    ref = jax.block_until_ready(_reference(x, y, feat, centers))
    assert jnp.allclose(loss, ref, rtol=1e-5, atol=1e-5), (loss, ref)

    print("KERNEL_OK")
</pallas_src>

<mosaic_0001>
module attributes {stable_mosaic.version = 11 : i64} {
  func.func @_ce_and_center_kernel(%arg0: i32, %arg1: memref<8x4xf32, #tpu.memory_space<vmem>>, %arg2: memref<8x4xf32, #tpu.memory_space<vmem>>, %arg3: memref<8x32xf32, #tpu.memory_space<vmem>>, %arg4: memref<1x32xf32, #tpu.memory_space<vmem>>, %arg5: memref<1xf32, #tpu.memory_space<smem>>, %arg6: memref<1xf32, #tpu.memory_space<smem>>) attributes {dimension_semantics = [#tpu.dimension_semantics<arbitrary>], iteration_bounds = array<i64: 1>, scalar_prefetch = 0 : i64, scratch_operands = 1 : i64, tpu.core_type = #tpu.core_type<tc>, window_params = [{transform_indices = @transform_0, window_bounds = array<i64: 8, 4>}, {transform_indices = @transform_1, window_bounds = array<i64: 8, 4>}, {transform_indices = @transform_2, window_bounds = array<i64: 8, 32>}, {pipeline_mode = #tpu.pipeline_mode<synchronous>, transform_indices = @transform_3, window_bounds = array<i64: 1, 32>}, {transform_indices = @transform_4, window_bounds = array<i64: 1>}]} {
    %c0_i32 = arith.constant 0 : i32
    %0 = arith.cmpi eq, %arg0, %c0_i32 : i32
    %1 = arith.extui %0 : i1 to i32
    %c0_i32_0 = arith.constant 0 : i32
    %2 = arith.cmpi ne, %1, %c0_i32_0 : i32
    scf.if %2 {
      %cst_25 = arith.constant 0.000000e+00 : f32
      %c0_26 = arith.constant 0 : index
      %63 = memref.load %arg6[%c0_26] : memref<1xf32, #tpu.memory_space<smem>>
      memref.store %cst_25, %arg6[%c0_26] : memref<1xf32, #tpu.memory_space<smem>>
    } else {
    }
    %c0 = arith.constant 0 : index
    %c0_1 = arith.constant 0 : index
    %3 = vector.load %arg1[%c0, %c0_1] : memref<8x4xf32, #tpu.memory_space<vmem>>, vector<8x4xf32>
    %c0_2 = arith.constant 0 : index
    %c0_3 = arith.constant 0 : index
    %4 = vector.load %arg2[%c0_2, %c0_3] : memref<8x4xf32, #tpu.memory_space<vmem>>, vector<8x4xf32>
    %c0_4 = arith.constant 0 : index
    %c0_5 = arith.constant 0 : index
    %5 = vector.load %arg3[%c0_4, %c0_5] : memref<8x32xf32, #tpu.memory_space<vmem>>, vector<8x32xf32>
    %c0_6 = arith.constant 0 : index
    %c0_7 = arith.constant 0 : index
    %6 = vector.load %arg4[%c0_6, %c0_7] : memref<1x32xf32, #tpu.memory_space<vmem>>, vector<1x32xf32>
    %cst = arith.constant dense<0xFF800000> : vector<8xf32>
    %7 = vector.multi_reduction <maximumf>, %3, %cst [1] : vector<8x4xf32> to vector<8xf32>
    %8 = vector.shape_cast %7 : vector<8xf32> to vector<8x1xf32>
    %9 = vector.broadcast %8 : vector<8x1xf32> to vector<8x4xf32>
    %10 = arith.subf %3, %9 : vector<8x4xf32>
    %11 = math.exp %10 : vector<8x4xf32>
    %cst_8 = arith.constant dense<0.000000e+00> : vector<8xf32>
    %12 = vector.multi_reduction <add>, %11, %cst_8 [1] : vector<8x4xf32> to vector<8xf32>
    %13 = vector.shape_cast %12 : vector<8xf32> to vector<8x1xf32>
    %14 = math.log %13 : vector<8x1xf32>
    %15 = vector.broadcast %14 : vector<8x1xf32> to vector<8x4xf32>
    %16 = arith.subf %10, %15 : vector<8x4xf32>
    %cst_9 = arith.constant -16.1180954 : f32
    %cst_10 = arith.constant -1.00000008E-7 : f32
    %17 = vector.broadcast %cst_9 : f32 to vector<8x4xf32>
    %18 = arith.maximumf %17, %16 : vector<8x4xf32>
    %19 = vector.broadcast %cst_10 : f32 to vector<8x4xf32>
    %20 = arith.minimumf %19, %18 : vector<8x4xf32>
    %cst_11 = arith.constant 1.000000e+00 : f32
    %21 = vector.broadcast %cst_11 : f32 to vector<8x1xf32>
    %22 = arith.divf %21, %13 : vector<8x1xf32>
    %23 = vector.broadcast %22 : vector<8x1xf32> to vector<8x4xf32>
    %24 = arith.mulf %11, %23 : vector<8x4xf32>
    %cst_12 = arith.constant 1.000000e-07 : f32
    %cst_13 = arith.constant 0.99999988 : f32
    %25 = vector.broadcast %cst_12 : f32 to vector<8x4xf32>
    %26 = arith.maximumf %25, %24 : vector<8x4xf32>
    %27 = vector.broadcast %cst_13 : f32 to vector<8x4xf32>
    %28 = arith.minimumf %27, %26 : vector<8x4xf32>
    %cst_14 = arith.constant 1.000000e+00 : f32
    %29 = vector.broadcast %cst_14 : f32 to vector<8x4xf32>
    %30 = arith.subf %29, %28 : vector<8x4xf32>
    %cst_15 = arith.constant 0.000000e+00 : f32
    %31 = vector.broadcast %cst_15 : f32 to vector<8x4xf32>
    %32 = arith.subf %31, %4 : vector<8x4xf32>
    %33 = arith.mulf %32, %20 : vector<8x4xf32>
    %34 = arith.mulf %30, %30 : vector<8x4xf32>
    %35 = arith.mulf %33, %34 : vector<8x4xf32>
    %cst_16 = arith.constant dense<0.000000e+00> : vector<8xf32>
    %36 = vector.multi_reduction <add>, %35, %cst_16 [1] : vector<8x4xf32> to vector<8xf32>
    %37 = vector.shape_cast %36 : vector<8xf32> to vector<8x1xf32>
    %cst_17 = arith.constant dense<0xFF800000> : vector<8xf32>
    %38 = vector.multi_reduction <maximumf>, %4, %cst_17 [1] : vector<8x4xf32> to vector<8xf32>
    %39 = vector.shape_cast %38 : vector<8xf32> to vector<8x1xf32>
    %40 = vector.extract_strided_slice %4 {offsets = [0, 0], sizes = [8, 1], strides = [1, 1]} : vector<8x4xf32> to vector<8x1xf32>
    %41 = arith.cmpf olt, %40, %39 : vector<8x1xf32>
    %42 = arith.extui %41 : vector<8x1xi1> to vector<8x1xi32>
    %43 = arith.sitofp %42 : vector<8x1xi32> to vector<8x1xf32>
    %44 = vector.broadcast %6 : vector<1x32xf32> to vector<8x32xf32>
    %45 = arith.subf %5, %44 : vector<8x32xf32>
    %46 = arith.mulf %45, %45 : vector<8x32xf32>
    %cst_18 = arith.constant dense<0.000000e+00> : vector<8xf32>
    %47 = vector.multi_reduction <add>, %46, %cst_18 [1] : vector<8x32xf32> to vector<8xf32>
    %48 = vector.shape_cast %47 : vector<8xf32> to vector<8x1xf32>
    %cst_19 = arith.constant 5.000000e-01 : f32
    %49 = vector.broadcast %cst_19 : f32 to vector<8x1xf32>
    %50 = arith.mulf %49, %43 : vector<8x1xf32>
    %51 = arith.mulf %50, %48 : vector<8x1xf32>
    %52 = arith.addf %37, %51 : vector<8x1xf32>
    %c0_20 = arith.constant 0 : index
    %53 = memref.load %arg6[%c0_20] : memref<1xf32, #tpu.memory_space<smem>>
    %54 = vector.shape_cast %52 : vector<8x1xf32> to vector<1x8x1xf32>
    %cst_21 = arith.constant dense<0.000000e+00> : vector<1xf32>
    %55 = vector.multi_reduction <add>, %54, %cst_21 [1, 2] : vector<1x8x1xf32> to vector<1xf32>
    %56 = vector.shape_cast %55 : vector<1xf32> to vector<1x1x1xf32>
    %57 = vector.extract %56[0, 0, 0] : f32 from vector<1x1x1xf32>
    %58 = arith.addf %53, %57 : f32
    %c0_22 = arith.constant 0 : index
    %59 = memref.load %arg6[%c0_22] : memref<1xf32, #tpu.memory_space<smem>>
    memref.store %58, %arg6[%c0_22] : memref<1xf32, #tpu.memory_space<smem>>
    %c0_i32_23 = arith.constant 0 : i32
    %60 = arith.cmpi eq, %arg0, %c0_i32_23 : i32
    %61 = arith.extui %60 : i1 to i32
    %c0_i32_24 = arith.constant 0 : i32
    %62 = arith.cmpi ne, %61, %c0_i32_24 : i32
    scf.if %62 {
      %c0_25 = arith.constant 0 : index
      %63 = memref.load %arg6[%c0_25] : memref<1xf32, #tpu.memory_space<smem>>
      %cst_26 = arith.constant 1.250000e-01 : f32
      %64 = arith.mulf %63, %cst_26 : f32
      %c0_27 = arith.constant 0 : index
      %65 = memref.load %arg5[%c0_27] : memref<1xf32, #tpu.memory_space<smem>>
      memref.store %64, %arg5[%c0_27] : memref<1xf32, #tpu.memory_space<smem>>
    } else {
    }
    return
  }
  func.func @transform_0(%arg0: i32) -> (i32, i32) {
    %c0_i32 = arith.constant 0 : i32
    %c0_i32_0 = arith.constant 0 : i32
    return %arg0, %c0_i32 : i32, i32
  }
  func.func @transform_1(%arg0: i32) -> (i32, i32) {
    %c0_i32 = arith.constant 0 : i32
    %c0_i32_0 = arith.constant 0 : i32
    return %arg0, %c0_i32 : i32, i32
  }
  func.func @transform_2(%arg0: i32) -> (i32, i32) {
    %c0_i32 = arith.constant 0 : i32
    %c0_i32_0 = arith.constant 0 : i32
    return %arg0, %c0_i32 : i32, i32
  }
  func.func @transform_3(%arg0: i32) -> (i32, i32) {
    %c0_i32 = arith.constant 0 : i32
    %c0_i32_0 = arith.constant 0 : i32
    %c0_i32_1 = arith.constant 0 : i32
    return %c0_i32, %c0_i32_0 : i32, i32
  }
  func.func @transform_4(%arg0: i32) -> i32 {
    %c0_i32 = arith.constant 0 : i32
    %c0_i32_0 = arith.constant 0 : i32
    return %c0_i32 : i32
  }
}

</mosaic_0001>

<bundles_post_ra>
// kernel: ce_and_center_loss.1
= control target key start
LH: loop header
LB: loop body
LE: loop exit
PB: predicated region body
PF: predicated region fallthrough
CT: control target
= control target key end

     0   :  { %vm28_vm0 = vcmask 31744   ;;  %s191_s0 = inlined_call_operand.vmem [shape: f32[8,4], index: 0, kind: input, shape index: {}]   ;;  %s192_s1 = inlined_call_operand.vmem [shape: f32[8,4], index: 1, kind: input, shape index: {}]   ;;  %s193_s2 = inlined_call_operand.vmem [shape: f32[8,32], index: 2, kind: input, shape index: {}]   ;;  %s194_s3 = inlined_call_operand.vmem [shape: f32[1,32], index: 3, kind: input, shape index: {}]   ;;  %s195_s4 = inlined_call_operand.hbm [shape: f32[1], index: 4, kind: output, shape index: {}]  }
   0x1   :  { %v24_v0 = vld [vmem:[%s191_s0] sm:$0xff] }
   0x2   :  { %9 = vsyncpa [#allocation4], 0  ;;  %v29_v1 = vsel %vm28_vm0, %v24_v0, -inf  ;;  %v25_v7 = vld [vmem:[%s192_s1] sm:$0xff]  ;;  %vm70_vm1 = vcmask 261120   ;;  %v136_v31 = vmov 0.0  }
   0x3   :  { %30 = vmax.xlane.f32.xlu0 %v29_v1  ;;  %v26_v8 = vld [vmem:[%s193_s2] sm:$0xff]  ;;  %v56_v10 = vsel %vm28_vm0, %v25_v7, -inf  ;;  %v49_v21 = vsub.f32 0.0, %v25_v7  ;;  %vm78_vm3 = vcmask 7168   ;;  %s124_s23 = scalar_lea.hbm %s195_s4, 16 }
   0x4   :  { %v113_v9 = vld [vmem:[%s194_s3] ss:$0 sm:$0xff]  ;;  %57 = vmax.xlane.f32.xlu1 %v56_v10  ;;  %p125_p0 = scmp.ne.s32.totalorder %s195_s4, %s124_s23  ;;  %p128_p1 = scmp.lt.u32.totalorder %s124_s23, %s195_s4 }
   0x5   :  { %v68_v11 = vsub.f32 %v26_v8, %v113_v9 }
   0x6   :  { %p130_p2 = pnand %p128_p1, %p125_p0 }
   0x7   :  { %v69_v12 = vmul.f32 %v68_v11, %v68_v11 }
   0x9   :  { %v71_v13 = vsel %vm70_vm1, %v69_v12, 0.0 }
   0xa   :  { %72 = vadd.xlane.f32.xlu1 %v71_v13 }
  0x90   :  { %v31_v2 = vpop.xlane.xlu0 %30 }
  0x91   :  { %v32_v3 = vsub.f32 %v24_v0, %v31_v2  ;;  %v58_v30 = vpop.xlane.xlu1 %57 }
  0x92   :  { %vm59_vm2 = vcmp.lt.f32.partialorder %v25_v7, %v58_v30 }
  0x93   :  { %v33_v4 = vmul.f32 1.442695, %v32_v3  ;;  %v112_v32 = vsel %vm59_vm2, 1.0, %v136_v31 }
  0x94   :  { %v74_v33 = vmul.f32 0.5, %v112_v32 }
  0x95   :  { %118 = vpow2.f32 %v33_v4 }
  0x97   :  { %v73_v34 = vpop.xlane.xlu1 %72 }
  0x98   :  { %v75_v35 = vmul.f32 %v74_v33, %v73_v34 }
  0x9f   :  { %v119_v5 = vpop.eup %118 }
  0xa0   :  { %v35_v6 = vsel %vm28_vm0, %v119_v5, 0.0 }
  0xa1   :  { %36 = vadd.xlane.f32.xlu0 %v35_v6 }
 0x12e   :  { %v37_v14 = vpop.xlane.xlu0 %36 }
 0x12f   :  { %120 = vlog2.f32 %v37_v14 }
 0x130   :  { %122 = vrcp.f32 %v37_v14 }
 0x139   :  { %v121_v15 = vpop.eup %120 }
 0x13a   :  { %v123_v16 = vpop.eup %122  ;;  %v39_v17 = vmul.f32 0.6931472, %v121_v15 }
 0x13b   :  { %v45_v18 = vmul.f32 %v123_v16, %v119_v5 }
 0x13c   :  { %v40_v19 = vsub.f32 %v32_v3, %v39_v17 }
 0x13d   :  { %v46_v20 = vmax.f32 %v45_v18, 1e-07 }
 0x13e   :  { %v41_v22 = vmax.f32 %v40_v19, -16.118095 }
 0x13f   :  { %v47_v23 = vmin.f32 %v46_v20, 0.9999999 }
 0x140   :  { %v42_v24 = vmin.f32 %v41_v22, -1.0000001e-07 }
 0x141   :  { %v48_v25 = vsub.f32 1.0, %v47_v23 }
 0x142   :  { %v50_v26 = vmul.f32 %v49_v21, %v42_v24 }
 0x143   :  { %v51_v27 = vmul.f32 %v48_v25, %v48_v25 }
 0x145   :  { %v52_v28 = vmul.f32 %v51_v27, %v50_v26 }
 0x147   :  { %v53_v29 = vsel %vm28_vm0, %v52_v28, 0.0 }
 0x148   :  { %54 = vadd.xlane.f32.xlu0 %v53_v29 }
 0x1d5   :  { %v55_v36 = vpop.xlane.xlu0 %54 }
 0x1d6   :  { %v76_v37 = vadd.f32 %v75_v35, %v55_v36 }
 0x1d8   :  { %v79_v38 = vsel %vm78_vm3, %v76_v37, 0.0 }
 0x1d9   :  { %80 = vadd.xlane.f32.xlu1 %v79_v38 }
 0x266   :  { %v81_v39 = vpop.xlane.xlu1 %80 }
 0x267   :  { %v82_v40 = vrot.slane %v81_v39, 4 }
 0x269   :  { %v83_v41 = vadd.f32 %v82_v40, %v81_v39 }
 0x26b   :  { %v84_v42 = vrot.slane %v83_v41, 2 }
 0x26d   :  { %v85_v43 = vadd.f32 %v84_v42, %v83_v41 }
 0x26f   :  { %v86_v44 = vrot.slane %v85_v43, 1 }
 0x271   :  { %v87_v45 = vadd.f32 %v86_v44, %v85_v43 }
 0x273   :  { %114 = vpush %v87_v45 }
 0x2a4   :  { %s115_s1 = spop %114 }
 0x2a5   :  { %s96_s2 = smul.f32 0.125, %s115_s1 }
 0x2a7   :  { %98 = sst [smem:[#allocation3]] %s96_s2 }
 0x2a8   :  { %133 = shalt.err (!%p130_p2)
}
 0x2a9   :  { %s137_s28 = smov [#allocation3]  }
 0x2aa   :  { %106 = dma.smem_to_hbm %s137_s28, 16, %s195_s4, [#allocation4]  }
 0x2ab   :  { %134 = dma.done.wait [#allocation4], 16  }
 0x2ac   :  { %135 = vsyncadd [#allocation4], 4294967280 }
 0x2ad   :  { %110 = sfence }
 0x2ae   :  { %111 = vsyncpa [#allocation4], 1 }

</bundles_post_ra>
